<compile_context>
chip_gen: v5e
topology: v5e:2x2
jax: 0.10.0
libtpu: 0.0.40
codegen_flags: <defaults>
</compile_context>

<pallas_src>
import functools

import jax
import jax.numpy as jnp
from jax.experimental import pallas as pl
from jax.experimental.pallas import tpu as pltpu


_TILE_BUDGET = 14 * 1024 * 1024   # bytes per streamed input buffer (double-buffered)
_VMEM_LIMIT = 48 * 1024 * 1024    # scoped VMEM limit (fits v5e/v6e/v7x)


# ---------------------------------------------------------------------------
# Kernels
# ---------------------------------------------------------------------------
def _mean_axis1_kernel(x_ref, out_ref, acc_ref, *, n_rows, tn, needs_mask, inv_count):
    """x_ref: (TB, TN, TD); mean over axis 1; acc_ref: (TB, TD) float32 scratch."""
    n_idx = pl.program_id(2)
    last = pl.num_programs(2) - 1

    @pl.when(n_idx == 0)
    def _():
        acc_ref[...] = jnp.zeros_like(acc_ref)

    x = x_ref[...].astype(jnp.float32)

    if needs_mask:
        # Unmasked accumulate on every step except the (partial) last one.
        @pl.when(n_idx != last)
        def _():
            acc_ref[...] += jnp.sum(x, axis=1)

        @pl.when(n_idx == last)
        def _():
            row = jax.lax.broadcasted_iota(jnp.int32, (1, x.shape[1], 1), 1)
            valid = (n_idx * tn + row) < n_rows
            acc_ref[...] += jnp.sum(jnp.where(valid, x, 0.0), axis=1)
    else:
        acc_ref[...] += jnp.sum(x, axis=1)

    @pl.when(n_idx == last)
    def _():
        out_ref[...] = (acc_ref[...] * inv_count).astype(out_ref.dtype)


def _mean_lane_kernel(x_ref, out_ref, acc_ref, *, n_cols, tn, needs_mask, inv_count):
    """x_ref: (TR, TN); mean over the lane axis; acc_ref: (TR, 1) float32 scratch."""
    n_idx = pl.program_id(1)
    last = pl.num_programs(1) - 1

    @pl.when(n_idx == 0)
    def _():
        acc_ref[...] = jnp.zeros_like(acc_ref)

    x = x_ref[...].astype(jnp.float32)

    if needs_mask:
        @pl.when(n_idx != last)
        def _():
            acc_ref[...] += jnp.sum(x, axis=1, keepdims=True)

        @pl.when(n_idx == last)
        def _():
            col = jax.lax.broadcasted_iota(jnp.int32, (1, x.shape[1]), 1)
            valid = (n_idx * tn + col) < n_cols
            acc_ref[...] += jnp.sum(jnp.where(valid, x, 0.0), axis=1, keepdims=True)
    else:
        acc_ref[...] += jnp.sum(x, axis=1, keepdims=True)

    @pl.when(n_idx == last)
    def _():
        out_ref[...] = (acc_ref[...] * inv_count).astype(out_ref.dtype)


# ---------------------------------------------------------------------------
# Tile selection
# ---------------------------------------------------------------------------
def _choose_tiles_axis1(B, N, D, in_itemsize, out_itemsize, budget):
    sub_in = max(8, 32 // in_itemsize)    # sublane packing of the streamed input
    sub_out = max(8, 32 // out_itemsize)  # sublane packing of the (TB, TD) output
    TD = D

    # Prefer TN = N (one long contiguous HBM run per batch row): how many full
    # (N, D) slabs fit in one streamed buffer?
    rows = budget // max(1, N * D * in_itemsize)

    if B <= sub_out:
        TB = B
    elif rows >= sub_out:
        TB = min((rows // sub_out) * sub_out, (B // sub_out) * sub_out)
    else:
        TB = sub_out

    if TB * N * TD * in_itemsize <= budget:
        TN = N
    else:
        TN = budget // max(1, TB * TD * in_itemsize)
        if N <= sub_in:
            TN = N
        else:
            TN = min((max(TN, sub_in) // sub_in) * sub_in, (N // sub_in) * sub_in)
        # Very wide feature dims: also split D along lanes so the tile fits.
        if TB * TN * TD * in_itemsize > budget and D > 128:
            TD = budget // max(1, TB * TN * in_itemsize)
            TD = min(D, max(128, (TD // 128) * 128))

    # Megacore (v7x has 2 TensorCores): prefer >= 2 blocks on a parallel axis.
    if pl.cdiv(B, TB) * pl.cdiv(D, TD) < 2:
        if B >= 2 * sub_out:
            TB = max(sub_out, ((B // 2) // sub_out) * sub_out)
        elif D >= 256:
            TD = 128 * pl.cdiv(pl.cdiv(D, 128), 2)

    return TB, TN, TD


def _choose_tiles_lane(R, N, in_itemsize, out_itemsize, budget):
    sub = max(8, 32 // in_itemsize, 32 // out_itemsize)
    rows = budget // max(1, N * in_itemsize)

    if R <= sub:
        TR = R
    elif rows >= sub:
        TR = min((rows // sub) * sub, (R // sub) * sub)
    else:
        TR = sub

    if TR * N * in_itemsize <= budget:
        TN = N
    else:
        TN = budget // max(1, TR * in_itemsize)
        if N > 128:
            TN = min((N // 128) * 128, max(128, (TN // 128) * 128))
        else:
            TN = N

    if pl.cdiv(R, TR) < 2 and R >= 2 * sub:
        TR = max(sub, ((R // 2) // sub) * sub)

    return TR, TN


# ---------------------------------------------------------------------------
# pallas_call wrappers
# ---------------------------------------------------------------------------
def _mean_axis1(x, n_count, out_dtype, tile_budget):
    """x: (B, NR, D) -> sum over axis 1 divided by n_count -> (B, D)."""
    B, NR, D = x.shape
    out_itemsize = jnp.dtype(out_dtype).itemsize
    TB, TN, TD = _choose_tiles_axis1(B, NR, D, x.dtype.itemsize, out_itemsize, tile_budget)
    grid = (pl.cdiv(B, TB), pl.cdiv(D, TD), pl.cdiv(NR, TN))

    kernel = functools.partial(
        _mean_axis1_kernel, n_rows=NR, tn=TN,
        needs_mask=(NR % TN != 0), inv_count=1.0 / float(n_count))

    cost = pl.CostEstimate(
        flops=B * NR * D, transcendentals=0,
        bytes_accessed=B * NR * D * x.dtype.itemsize + B * D * out_itemsize)

    return pl.pallas_call(
        kernel,
        out_shape=jax.ShapeDtypeStruct((B, D), out_dtype),
        grid_spec=pltpu.PrefetchScalarGridSpec(
            num_scalar_prefetch=0,
            grid=grid,
            in_specs=[pl.BlockSpec((TB, TN, TD), lambda b, d, n: (b, n, d))],
            out_specs=pl.BlockSpec((TB, TD), lambda b, d, n: (b, d)),
            scratch_shapes=[pltpu.VMEM((TB, TD), jnp.float32)],
        ),
        compiler_params=pltpu.CompilerParams(
            dimension_semantics=("parallel", "parallel", "arbitrary"),
            vmem_limit_bytes=_VMEM_LIMIT),
        cost_estimate=cost,
    )(x)


def _mean_lane(x, out_dtype, tile_budget):
    """x: (R, N) -> mean over the last (lane) axis -> (R, 1)."""
    R, N = x.shape
    out_itemsize = jnp.dtype(out_dtype).itemsize
    TR, TN = _choose_tiles_lane(R, N, x.dtype.itemsize, out_itemsize, tile_budget)
    grid = (pl.cdiv(R, TR), pl.cdiv(N, TN))

    kernel = functools.partial(
        _mean_lane_kernel, n_cols=N, tn=TN,
        needs_mask=(N % TN != 0), inv_count=1.0 / float(N))

    cost = pl.CostEstimate(
        flops=R * N, transcendentals=0,
        bytes_accessed=R * N * x.dtype.itemsize + R * out_itemsize)

    return pl.pallas_call(
        kernel,
        out_shape=jax.ShapeDtypeStruct((R, 1), out_dtype),
        grid_spec=pltpu.PrefetchScalarGridSpec(
            num_scalar_prefetch=0,
            grid=grid,
            in_specs=[pl.BlockSpec((TR, TN), lambda r, n: (r, n))],
            out_specs=pl.BlockSpec((TR, 1), lambda r, n: (r, 0)),
            scratch_shapes=[pltpu.VMEM((TR, 1), jnp.float32)],
        ),
        compiler_params=pltpu.CompilerParams(
            dimension_semantics=("parallel", "arbitrary"),
            vmem_limit_bytes=_VMEM_LIMIT),
        cost_estimate=cost,
    )(x)


# ---------------------------------------------------------------------------
# Public entry point (matches PrototypeLayer.forward)
# ---------------------------------------------------------------------------
def prototype_layer(inputs, dim=1, *, tile_budget=_TILE_BUDGET):
    """Mean over axis `dim` — PyTorch PrototypeLayer.forward."""
    inputs = jnp.asarray(inputs)
    nd = inputs.ndim
    d = dim % nd
    shape = inputs.shape
    N = shape[d]
    out_shape = shape[:d] + shape[d + 1:]

    out_dtype = inputs.dtype
    if jnp.issubdtype(out_dtype, jnp.integer) or jnp.issubdtype(out_dtype, jnp.bool_):
        out_dtype = jnp.float32   # integer mean is fractional

    lead = 1
    for s in shape[:d]:
        lead *= s
    trail = 1
    for s in shape[d + 1:]:
        trail *= s

    if N == 1:
        return inputs.reshape(out_shape).astype(out_dtype)

    if trail == 1:
        # Reducing the innermost axis: lane reduction, no transpose, lane-dense reads.
        x2 = inputs.reshape(lead, N)
        out = _mean_lane(x2, out_dtype, tile_budget)          # (lead, 1)
        return out.reshape(out_shape)

    # Pure reshape (no transpose): (lead, N, trail); leading dims -> batch,
    # trailing dims -> lanes.
    x3 = inputs.reshape(lead, N, trail)

    # Lane-densify small feature dims: fold k consecutive reduction rows into the
    # lane axis (contiguous reshape); fold the k groups back in a tiny f32 epilogue.
    k = 1
    if trail < 128:
        for cand in range(min(128 // trail, N), 1, -1):
            if N % cand == 0:
                k = cand
                break

    if k > 1:
        x3f = x3.reshape(lead, N // k, k * trail)
        part = _mean_axis1(x3f, n_count=N, out_dtype=jnp.float32,
                           tile_budget=tile_budget)           # (lead, k*trail)
        out = part.reshape(lead, k, trail).sum(axis=1).astype(out_dtype)
    else:
        out = _mean_axis1(x3, n_count=N, out_dtype=out_dtype,
                          tile_budget=tile_budget)            # (lead, trail)

    return out.reshape(out_shape)


# ---------------------------------------------------------------------------
# Self-test
# ---------------------------------------------------------------------------
if __name__ == "__main__":
    key = jax.random.PRNGKey(0)
    k1, k2, k3, k4, k5 = jax.random.split(key, 5)

    # 1) Canonical prototype use: (batch, n_support, features), default dim=1.
    x1 = jax.random.normal(k1, (8, 16, 128), dtype=jnp.float32)
    y1 = prototype_layer(x1)
    jax.block_until_ready(y1)
    assert y1.shape == (8, 128)
    assert jnp.allclose(y1, jnp.mean(x1, axis=1), atol=1e-5, rtol=1e-5)

    # 2) bf16 input: f32 in-kernel accumulation, bf16 output.
    y1b = prototype_layer(x1.astype(jnp.bfloat16))
    jax.block_until_ready(y1b)
    assert y1b.dtype == jnp.bfloat16
    assert jnp.allclose(y1b.astype(jnp.float32), jnp.mean(x1, axis=1),
                        atol=2e-2, rtol=2e-2)

    # 3) 4-D tensor, interior dim (small-D lane-folding path).
    x2 = jax.random.normal(k2, (2, 4, 16, 16), dtype=jnp.float32)
    y2 = prototype_layer(x2, dim=2)
    jax.block_until_ready(y2)
    assert y2.shape == (2, 4, 16)
    assert jnp.allclose(y2, jnp.mean(x2, axis=2), atol=1e-5, rtol=1e-5)

    # 4) Reduction over the last axis (lane-reduction kernel, no transpose).
    x3 = jax.random.normal(k3, (4, 8, 32), dtype=jnp.float32)
    y3 = prototype_layer(x3, dim=-1)
    jax.block_until_ready(y3)
    assert y3.shape == (4, 8)
    assert jnp.allclose(y3, jnp.mean(x3, axis=-1), atol=1e-5, rtol=1e-5)

    # 5) dim=0 (batch collapses to 1; D-split keeps both v7x TensorCores busy).
    x4 = jax.random.normal(k4, (16, 8, 128), dtype=jnp.float32)
    y4 = prototype_layer(x4, dim=0)
    jax.block_until_ready(y4)
    assert y4.shape == (8, 128)
    assert jnp.allclose(y4, jnp.mean(x4, axis=0), atol=1e-5, rtol=1e-5)

    # 6) Tiny tile budgets to exercise the masked N-tail paths of both kernels.
    x5 = jax.random.normal(k5, (16, 100, 128), dtype=jnp.float32)
    y5 = prototype_layer(x5, tile_budget=128 * 1024)
    jax.block_until_ready(y5)
    assert jnp.allclose(y5, jnp.mean(x5, axis=1), atol=1e-5, rtol=1e-5)

    x6 = jax.random.normal(k1, (40, 300), dtype=jnp.float32)
    y6 = prototype_layer(x6, dim=1, tile_budget=8 * 1024)
    jax.block_until_ready(y6)
    assert jnp.allclose(y6, jnp.mean(x6, axis=1), atol=1e-5, rtol=1e-5)

    print("KERNEL_OK")
</pallas_src>

<mosaic_0001>
module attributes {stable_mosaic.version = 11 : i64} {
  func.func @_mean_axis1_kernel(%arg0: i32, %arg1: i32, %arg2: i32, %arg3: memref<8x16x128xf32, #tpu.memory_space<vmem>>, %arg4: memref<8x128xf32, #tpu.memory_space<vmem>>, %arg5: memref<8x128xf32, #tpu.memory_space<vmem>>) attributes {dimension_semantics = [#tpu.dimension_semantics<parallel>, #tpu.dimension_semantics<parallel>, #tpu.dimension_semantics<arbitrary>], iteration_bounds = array<i64: 1, 1, 1>, scalar_prefetch = 0 : i64, scratch_operands = 1 : i64, tpu.core_type = #tpu.core_type<tc>, window_params = [{transform_indices = @transform_0, window_bounds = array<i64: 8, 16, 128>}, {transform_indices = @transform_1, window_bounds = array<i64: 8, 128>}]} {
    %c0_i32 = arith.constant 0 : i32
    %0 = arith.cmpi eq, %arg2, %c0_i32 : i32
    %1 = arith.extui %0 : i1 to i32
    %c0_i32_0 = arith.constant 0 : i32
    %2 = arith.cmpi ne, %1, %c0_i32_0 : i32
    scf.if %2 {
      %cst_9 = arith.constant 0.000000e+00 : f32
      %11 = vector.broadcast %cst_9 : f32 to vector<8x128xf32>
      %c0_10 = arith.constant 0 : index
      %c0_11 = arith.constant 0 : index
      %12 = vector.load %arg5[%c0_10, %c0_11] : memref<8x128xf32, #tpu.memory_space<vmem>>, vector<8x128xf32>
      tpu.vector_store %arg5[%c0_10, %c0_11], %11 {strides = array<i32>} : memref<8x128xf32, #tpu.memory_space<vmem>>, vector<8x128xf32>,
    } else {
    }
    %c0 = arith.constant 0 : index
    %c0_1 = arith.constant 0 : index
    %c0_2 = arith.constant 0 : index
    %3 = vector.load %arg3[%c0, %c0_1, %c0_2] : memref<8x16x128xf32, #tpu.memory_space<vmem>>, vector<8x16x128xf32>
    %c0_3 = arith.constant 0 : index
    %c0_4 = arith.constant 0 : index
    %4 = vector.load %arg5[%c0_3, %c0_4] : memref<8x128xf32, #tpu.memory_space<vmem>>, vector<8x128xf32>
    %cst = arith.constant dense<0.000000e+00> : vector<8x128xf32>
    %5 = vector.multi_reduction <add>, %3, %cst [1] : vector<8x16x128xf32> to vector<8x128xf32>
    %6 = arith.addf %4, %5 : vector<8x128xf32>
    %c0_5 = arith.constant 0 : index
    %c0_6 = arith.constant 0 : index
    %7 = vector.load %arg5[%c0_5, %c0_6] : memref<8x128xf32, #tpu.memory_space<vmem>>, vector<8x128xf32>
    tpu.vector_store %arg5[%c0_5, %c0_6], %6 {strides = array<i32>} : memref<8x128xf32, #tpu.memory_space<vmem>>, vector<8x128xf32>,
    %c0_i32_7 = arith.constant 0 : i32
    %8 = arith.cmpi eq, %arg2, %c0_i32_7 : i32
    %9 = arith.extui %8 : i1 to i32
    %c0_i32_8 = arith.constant 0 : i32
    %10 = arith.cmpi ne, %9, %c0_i32_8 : i32
    scf.if %10 {
      %c0_9 = arith.constant 0 : index
      %c0_10 = arith.constant 0 : index
      %11 = vector.load %arg5[%c0_9, %c0_10] : memref<8x128xf32, #tpu.memory_space<vmem>>, vector<8x128xf32>
      %cst_11 = arith.constant 6.250000e-02 : f32
      %12 = vector.broadcast %cst_11 : f32 to vector<8x128xf32>
      %13 = arith.mulf %11, %12 : vector<8x128xf32>
      %c0_12 = arith.constant 0 : index
      %c0_13 = arith.constant 0 : index
      %14 = vector.load %arg4[%c0_12, %c0_13] : memref<8x128xf32, #tpu.memory_space<vmem>>, vector<8x128xf32>
      tpu.vector_store %arg4[%c0_12, %c0_13], %13 {strides = array<i32>} : memref<8x128xf32, #tpu.memory_space<vmem>>, vector<8x128xf32>,
    } else {
    }
    return
  }
  func.func @transform_0(%arg0: i32, %arg1: i32, %arg2: i32) -> (i32, i32, i32) {
    %c0_i32 = arith.constant 0 : i32
    return %arg0, %arg2, %arg1 : i32, i32, i32
  }
  func.func @transform_1(%arg0: i32, %arg1: i32, %arg2: i32) -> (i32, i32) {
    %c0_i32 = arith.constant 0 : i32
    return %arg0, %arg1 : i32, i32
  }
}

</mosaic_0001>

<bundles_post_ra>
// kernel: tpu_custom_call.1
= control target key start
LH: loop header
LB: loop body
LE: loop exit
PB: predicated region body
PF: predicated region fallthrough
CT: control target
= control target key end

     0   :  { %6 = vsyncpa [#allocation4], 0  ;;  %s229_s0 = inlined_call_operand.hbm [shape: f32[8,16,128], index: 0, kind: input, shape index: {}]   ;;  %s230_s1 = inlined_call_operand.hbm [shape: f32[8,128], index: 1, kind: output, shape index: {}]  }
   0x1   :  { %7 = vsyncpa [#allocation5], 0  ;;  %s12_s8 = sshll.u32 %s229_s0, 4  ;;  %s207_s9 = smov [#allocation3]   ;;  %s13_s8 = int_to_ptr.hbm [resolvable:$true] %s12_s8 }
   0x2   :  { %s14_s10 = sshll.u32 %s207_s9, 4  ;;  %s208_s11 = smov 128   ;;  %s15_s10 = int_to_ptr.vmem [resolvable:$true] %s14_s10 }
   0x3   :  { %s209_s12 = smov 8  }
   0x4   :  { %20 = dma.hbm_to_vmem [thread:$0]  %s13_s8, 2048, %s15_s10, [#allocation4], %s208_s11, %s208_s11, %s209_s12  }
   0x5   :  { %203 = dma.done.wait [#allocation4], 2048  }
   0x6   :  { %204 = vsyncadd [#allocation4], 4294965248  ;;  %v30_v0 = vld [vmem:[#allocation3] sm:$0xff]  ;;  %v31_v1 = vld [vmem:[#allocation3 + $0x8] sm:$0xff]  ;;  %vm111_vm0 = vcmask 1041409   ;;  %vm113_vm1 = vcmask 1042434  }
   0x7   :  { %v32_v2 = vld [vmem:[#allocation3 + $0x10] sm:$0xff]  ;;  %v33_v3 = vld [vmem:[#allocation3 + $0x18] sm:$0xff]  ;;  %v34_v4 = vld [vmem:[#allocation3 + $0x20] sm:$0xff]  ;;  %v47_v6 = vadd.f32 %v31_v1, %v30_v0  ;;  %vm115_vm2 = vcmask 1043459   ;;  %vm117_vm3 = vcmask 1044484   ;;  %vm119_vm4 = vcmask 1045509  }
   0x8   :  { %v35_v5 = vld [vmem:[#allocation3 + $0x28] sm:$0xff]  ;;  %v36_v7 = vld [vmem:[#allocation3 + $0x30] sm:$0xff]  ;;  %v37_v8 = vld [vmem:[#allocation3 + $0x38] sm:$0xff]  ;;  %v54_v10 = vadd.f32 %v33_v3, %v32_v2  ;;  %vm121_vm5 = vcmask 1046534   ;;  %vm123_vm6 = vcmask 1047559   ;;  %s210_s0 = smov [#allocation6]  }
   0x9   :  { %v38_v9 = vld [vmem:[#allocation3 + $0x40] sm:$0xff]  ;;  %v61_v11 = vadd.f32 %v35_v5, %v34_v4  ;;  %v39_v12 = vld [vmem:[#allocation3 + $0x48] sm:$0xff]  ;;  %v40_v13 = vld [vmem:[#allocation3 + $0x50] sm:$0xff]  ;;  %v48_v15 = vrot.slane %v47_v6, 4  ;;  %v68_v16 = vadd.f32 %v37_v8, %v36_v7  ;;  %s139_s13 = sshll.u32 %s210_s0, 4  ;;  %s141_s16 = sshll.u32 %s230_s1, 4  ;;  %s140_s13 = int_to_ptr.vmem [resolvable:$true] %s139_s13  ;;  %s142_s16 = int_to_ptr.hbm [resolvable:$true] %s141_s16 }
   0xa   :  { %v41_v14 = vld [vmem:[#allocation3 + $0x58] sm:$0xff]  ;;  %v42_v17 = vld [vmem:[#allocation3 + $0x60] sm:$0xff]  ;;  %v43_v18 = vld [vmem:[#allocation3 + $0x68] sm:$0xff]  ;;  %v55_v20 = vrot.slane %v54_v10, 4  ;;  %v75_v22 = vadd.f32 %v39_v12, %v38_v9 }
   0xb   :  { %v44_v19 = vld [vmem:[#allocation3 + $0x70] sm:$0xff]  ;;  %v62_v21 = vrot.slane %v61_v11, 4  ;;  %v82_v23 = vadd.f32 %v41_v14, %v40_v13  ;;  %v45_v24 = vld [vmem:[#allocation3 + $0x78] sm:$0xff]  ;;  %v49_v25 = vadd.f32 %v48_v15, %v47_v6  ;;  %v69_v26 = vrot.slane %v68_v16, 4 }
   0xc   :  { %v89_v27 = vadd.f32 %v43_v18, %v42_v17  ;;  %v56_v28 = vadd.f32 %v55_v20, %v54_v10  ;;  %v76_v30 = vrot.slane %v75_v22, 4  ;;  %v96_v35 = vadd.f32 %v45_v24, %v44_v19 }
   0xd   :  { %v63_v29 = vadd.f32 %v62_v21, %v61_v11  ;;  %v83_v31 = vrot.slane %v82_v23, 4  ;;  %v50_v32 = vrot.slane %v49_v25, 2  ;;  %v70_v33 = vadd.f32 %v69_v26, %v68_v16 }
   0xe   :  { %v90_v34 = vrot.slane %v89_v27, 4  ;;  %v57_v36 = vrot.slane %v56_v28, 2  ;;  %v77_v38 = vadd.f32 %v76_v30, %v75_v22  ;;  %v97_v43 = vrot.slane %v96_v35, 4 }
   0xf   :  { %v64_v37 = vrot.slane %v63_v29, 2  ;;  %v84_v39 = vadd.f32 %v83_v31, %v82_v23  ;;  %v51_v40 = vadd.f32 %v50_v32, %v49_v25  ;;  %v71_v41 = vrot.slane %v70_v33, 2 }
  0x10   :  { %v91_v42 = vadd.f32 %v90_v34, %v89_v27  ;;  %v58_v44 = vadd.f32 %v57_v36, %v56_v28  ;;  %v78_v46 = vrot.slane %v77_v38, 2  ;;  %v98_v51 = vadd.f32 %v97_v43, %v96_v35 }
  0x11   :  { %v65_v45 = vadd.f32 %v64_v37, %v63_v29  ;;  %v85_v47 = vrot.slane %v84_v39, 2  ;;  %v52_v48 = vrot.slane %v51_v40, 1  ;;  %v72_v49 = vadd.f32 %v71_v41, %v70_v33 }
  0x12   :  { %v92_v50 = vrot.slane %v91_v42, 2  ;;  %v59_v52 = vrot.slane %v58_v44, 1  ;;  %v79_v54 = vadd.f32 %v78_v46, %v77_v38  ;;  %v99_v59 = vrot.slane %v98_v51, 2 }
  0x13   :  { %v66_v53 = vrot.slane %v65_v45, 1  ;;  %v86_v55 = vadd.f32 %v85_v47, %v84_v39  ;;  %v53_v56 = vadd.f32 %v52_v48, %v51_v40  ;;  %v73_v57 = vrot.slane %v72_v49, 1 }
  0x14   :  { %v93_v58 = vadd.f32 %v92_v50, %v91_v42  ;;  %v60_v60 = vadd.f32 %v59_v52, %v58_v44  ;;  %v80_v62 = vrot.slane %v79_v54, 1  ;;  %v100_v2 = vadd.f32 %v99_v59, %v98_v51 }
  0x15   :  { %v67_v61 = vadd.f32 %v66_v53, %v65_v45  ;;  %v87_v63 = vrot.slane %v86_v55, 1  ;;  %v74_v0 = vadd.f32 %v73_v57, %v72_v49 }
  0x16   :  { %v94_v1 = vrot.slane %v93_v58, 1  ;;  %v81_v3 = vadd.f32 %v80_v62, %v79_v54  ;;  %v112_v5 = vsel %vm111_vm0, %v60_v60, %v53_v56  ;;  %v101_v7 = vrot.slane %v100_v2, 1 }
  0x17   :  { %v88_v4 = vadd.f32 %v87_v63, %v86_v55  ;;  %v114_v8 = vsel %vm113_vm1, %v67_v61, %v112_v5 }
  0x18   :  { %v95_v6 = vadd.f32 %v94_v1, %v93_v58  ;;  %v116_v9 = vsel %vm115_vm2, %v74_v0, %v114_v8  ;;  %v102_v10 = vadd.f32 %v101_v7, %v100_v2 }
  0x19   :  { %v118_v11 = vsel %vm117_vm3, %v81_v3, %v116_v9 }
  0x1a   :  { %v120_v12 = vsel %vm119_vm4, %v88_v4, %v118_v11 }
  0x1b   :  { %v122_v13 = vsel %vm121_vm5, %v95_v6, %v120_v12 }
  0x1c   :  { %v124_v14 = vsel %vm123_vm6, %v102_v10, %v122_v13 }
  0x1d   :  { %v132_v15 = vmul.f32 0.0625, %v124_v14 }
  0x1f   :  { %133 = vst [vmem:[#allocation6] sm:$0xff] %v132_v15 }
  0x20   :  { %144 = dma.vmem_to_hbm [thread:$0]  %s140_s13, 128, %s142_s16, [#allocation5]  }
  0x21   :  { %205 = dma.done.wait [#allocation5], 128  }
  0x22   :  { %206 = vsyncadd [#allocation5], 4294967168 }
  0x23   :  { %149 = vsyncpa [#allocation4], 1 }
  0x24   :  { %150 = vsyncpa [#allocation5], 1 }

</bundles_post_ra>
